<compile_context>
chip_gen: v5e
topology: v5e:2x2
jax: 0.10.0
libtpu: 0.0.40
codegen_flags: <defaults>
</compile_context>

<pallas_src>
import functools

import jax
import jax.numpy as jnp
from jax.experimental import pallas as pl
from jax.experimental.pallas import tpu as pltpu

INPUT_DIM = 2
HIDDEN_DIM = 128
OUTPUT_DIM = 1
_TILE_CEILING = 2048


def _round_up(n, m):
    return ((n + m - 1) // m) * m


def _tpu_generation():
    try:
        kind = jax.devices()[0].device_kind.lower()
    except Exception:  # pragma: no cover - defensive
        return "unknown"
    if "v7" in kind:
        return "v7x"
    if "v6" in kind or "trillium" in kind:
        return "v6e"
    if "v5 lite" in kind or "v5e" in kind or "v5litepod" in kind:
        return "v5e"
    if "v5" in kind:
        return "v5p"
    return "unknown"


def _choose_tile(bp, ceiling, min_steps):
    """Largest multiple of 128 that divides bp, <= ceiling, giving >= min_steps steps."""
    target = bp // min_steps if bp // min_steps >= 128 else bp
    t = max(128, (min(ceiling, target) // 128) * 128)
    while t > 128 and bp % t != 0:
        t -= 128
    return t


def _mlp_kernel(x_ref, w1_ref, b1_ref, w2_ref, b2_ref, w3_ref, b3_ref, o_ref,
                *, act_dtype):
    # Activations are [features, batch_tile]; batch on the lane axis.
    x = x_ref[...]            # (INPUT_DIM, tile_m) f32
    w1t = w1_ref[...]         # (HIDDEN_DIM, INPUT_DIM) f32

    # ---- Layer 1: K = 2 -> two VPU rank-1 updates (skip the MXU). ----------
    h1_pre = b1_ref[...]      # (HIDDEN_DIM, 1) f32, broadcasts over lanes
    for k in range(INPUT_DIM):  # static unroll (INPUT_DIM == 2)
        h1_pre = h1_pre + w1t[:, k:k + 1] * x[k:k + 1, :]
    h1 = jnp.tanh(h1_pre.astype(act_dtype))          # (HIDDEN_DIM, tile_m), EUP

    # ---- Layer 2: the only big matmul (128 x 128) on the MXU. --------------
    h2_pre = jnp.dot(w2_ref[...], h1, preferred_element_type=jnp.float32)
    h2 = jnp.tanh(h2_pre.astype(act_dtype) + b2_ref[...])   # (HIDDEN_DIM, tile_m)

    # ---- Layer 3: (1,128)x(128,tile_m) on the (idle) MXU -> lane-dense out. -
    out = jnp.dot(w3_ref[...], h2, preferred_element_type=jnp.float32) + b3_ref[0]
    o_ref[...] = out.astype(o_ref.dtype)             # (1, tile_m) unmasked vst


@functools.partial(jax.jit,
                   static_argnames=("tile_m", "act_dtype", "core_parallel"))
def _forward_impl(x, w1, b1, w2, b2, w3, b3, *, tile_m, act_dtype, core_parallel):
    B, D = x.shape
    assert D == INPUT_DIM
    Bp = _round_up(B, tile_m)
    grid_steps = Bp // tile_m

    # Single fused pad over the (features, batch) layout.
    x_t = jnp.pad(x.T, ((0, 0), (0, Bp - B)))        # (INPUT_DIM, Bp)

    # Kernel-friendly weight layouts (y.T = W @ x.T formulation).
    w1_t = w1.T                                       # (HIDDEN_DIM, INPUT_DIM) f32
    b1_c = b1.reshape(HIDDEN_DIM, 1)                  # f32
    w2_t = w2.T.astype(act_dtype)                     # (HIDDEN_DIM, HIDDEN_DIM)
    b2_c = b2.reshape(HIDDEN_DIM, 1).astype(act_dtype)
    w3_r = w3.reshape(HIDDEN_DIM, OUTPUT_DIM).T.astype(act_dtype)  # (1, HIDDEN_DIM)
    b3_s = b3.reshape((1,)).astype(jnp.float32)       # scalar bias -> SMEM

    rep = lambda i: (0, 0)                            # weights: same block every step
    in_specs = [
        pl.BlockSpec((INPUT_DIM, tile_m), lambda i: (0, i)),        # x tile
        pl.BlockSpec((HIDDEN_DIM, INPUT_DIM), rep),                 # w1.T
        pl.BlockSpec((HIDDEN_DIM, 1), rep),                         # b1
        pl.BlockSpec((HIDDEN_DIM, HIDDEN_DIM), rep),                # w2.T
        pl.BlockSpec((HIDDEN_DIM, 1), rep),                         # b2
        pl.BlockSpec((OUTPUT_DIM, HIDDEN_DIM), rep),                # w3 row
        pl.BlockSpec(memory_space=pltpu.MemorySpace.SMEM),          # b3 scalar
    ]
    out_specs = pl.BlockSpec((1, tile_m), lambda i: (0, i))         # lane-dense out

    use_core_parallel = core_parallel and grid_steps >= 2
    semantics = (pltpu.CORE_PARALLEL,) if use_core_parallel else ("parallel",)

    out_t = pl.pallas_call(
        functools.partial(_mlp_kernel, act_dtype=act_dtype),
        out_shape=jax.ShapeDtypeStruct((1, Bp), jnp.float32),
        grid_spec=pltpu.PrefetchScalarGridSpec(
            num_scalar_prefetch=0,
            grid=(grid_steps,),
            in_specs=in_specs,
            out_specs=out_specs,
        ),
        compiler_params=pltpu.CompilerParams(dimension_semantics=semantics),
    )(x_t, w1_t, b1_c, w2_t, b2_c, w3_r, b3_s)

    return out_t[0, :B].reshape(B, OUTPUT_DIM)


def discriminator_forward(x, params, *, tile_m=None, force_f32=False):
    """x: [B, INPUT_DIM] float32 -> [B, OUTPUT_DIM] float32."""
    w1, b1, w2, b2, w3, b3 = params
    B = int(x.shape[0])
    gen = _tpu_generation()

    # bf16 activations only where the VPU/EUP are bf16-capable (v6e / v7x).
    if force_f32 or gen in ("v5e", "v5p", "unknown"):
        act_dtype = jnp.float32
    else:
        act_dtype = jnp.bfloat16

    core_parallel = gen == "v7x"

    bp128 = _round_up(max(B, 1), 128)
    if tile_m is None:
        min_steps = 2 if (core_parallel and bp128 >= 256) else 1
        tile_m = _choose_tile(bp128, _TILE_CEILING, min_steps)
    else:
        tile_m = max(128, _round_up(int(tile_m), 128))

    return _forward_impl(x, w1, b1, w2, b2, w3, b3,
                         tile_m=tile_m, act_dtype=act_dtype,
                         core_parallel=core_parallel)


def init_params(key):
    """Deterministic init mimicking PyTorch nn.Linear default (U[-1/sqrt(fan_in), +])."""
    ks = jax.random.split(key, 6)

    def linear(kw, kb, fan_in, fan_out):
        bound = 1.0 / jnp.sqrt(jnp.float32(fan_in))
        w = jax.random.uniform(kw, (fan_in, fan_out), jnp.float32, -bound, bound)
        b = jax.random.uniform(kb, (1, fan_out), jnp.float32, -bound, bound)
        return w, b

    w1, b1 = linear(ks[0], ks[1], INPUT_DIM, HIDDEN_DIM)
    w2, b2 = linear(ks[2], ks[3], HIDDEN_DIM, HIDDEN_DIM)
    w3, b3 = linear(ks[4], ks[5], HIDDEN_DIM, OUTPUT_DIM)
    return (w1, b1, w2, b2, w3, b3)


def reference_forward(x, params):
    w1, b1, w2, b2, w3, b3 = params
    h1 = jnp.tanh(x @ w1 + b1)
    h2 = jnp.tanh(h1 @ w2 + b2)
    return h2 @ w3 + b3


if __name__ == "__main__":
    key = jax.random.PRNGKey(0)
    pkey, xkey = jax.random.split(key)
    params = init_params(pkey)

    # 1) Bit-faithful f32 path, tiny batch consistent with the module.
    batch = 8
    x = jax.random.normal(xkey, (batch, INPUT_DIM), jnp.float32)
    out_f32 = jax.block_until_ready(
        discriminator_forward(x, params, force_f32=True))
    ref = reference_forward(x, params)
    assert out_f32.shape == (batch, OUTPUT_DIM), out_f32.shape
    assert jnp.allclose(out_f32, ref, atol=1e-5, rtol=1e-5), (out_f32, ref)

    # 2) Default fast path (bf16 activations on v6e/v7x, f32 on v5e) with a
    #    non-aligned batch and an explicit small tile -> multi-step grid.
    batch2 = 300
    x2 = jax.random.normal(jax.random.PRNGKey(1), (batch2, INPUT_DIM), jnp.float32)
    ref2 = reference_forward(x2, params)

    out_small_tile = jax.block_until_ready(
        discriminator_forward(x2, params, tile_m=128))
    assert out_small_tile.shape == (batch2, OUTPUT_DIM), out_small_tile.shape
    assert jnp.allclose(out_small_tile, ref2, atol=5e-2, rtol=5e-2)

    # 3) Default auto tile selection (divisor-based, padded batch).
    out_auto = jax.block_until_ready(discriminator_forward(x2, params))
    assert out_auto.shape == (batch2, OUTPUT_DIM), out_auto.shape
    assert jnp.allclose(out_auto, ref2, atol=5e-2, rtol=5e-2)

    print("KERNEL_OK")
</pallas_src>

<mosaic_0001>
module attributes {stable_mosaic.version = 11 : i64} {
  func.func @_mlp_kernel(%arg0: i32, %arg1: memref<2x128xf32, #tpu.memory_space<vmem>>, %arg2: memref<128x2xf32, #tpu.memory_space<vmem>>, %arg3: memref<128x1xf32, #tpu.memory_space<vmem>>, %arg4: memref<128x128xf32, #tpu.memory_space<vmem>>, %arg5: memref<128x1xf32, #tpu.memory_space<vmem>>, %arg6: memref<1x128xf32, #tpu.memory_space<vmem>>, %arg7: memref<1xf32, #tpu.memory_space<smem>>, %arg8: memref<1x128xf32, #tpu.memory_space<vmem>>) attributes {dimension_semantics = [#tpu.dimension_semantics<parallel>], iteration_bounds = array<i64: 1>, scalar_prefetch = 0 : i64, scratch_operands = 0 : i64, tpu.core_type = #tpu.core_type<tc>, window_params = [{transform_indices = @transform_0, window_bounds = array<i64: 2, 128>}, {pipeline_mode = #tpu.pipeline_mode<synchronous>, transform_indices = @transform_1, window_bounds = array<i64: 128, 2>}, {pipeline_mode = #tpu.pipeline_mode<synchronous>, transform_indices = @transform_2, window_bounds = array<i64: 128, 1>}, {pipeline_mode = #tpu.pipeline_mode<synchronous>, transform_indices = @transform_3, window_bounds = array<i64: 128, 128>}, {pipeline_mode = #tpu.pipeline_mode<synchronous>, transform_indices = @transform_4, window_bounds = array<i64: 128, 1>}, {pipeline_mode = #tpu.pipeline_mode<synchronous>, transform_indices = @transform_5, window_bounds = array<i64: 1, 128>}, {transform_indices = @transform_6, window_bounds = array<i64: 1>}, {transform_indices = @transform_7, window_bounds = array<i64: 1, 128>}]} {
    %c0 = arith.constant 0 : index
    %c0_0 = arith.constant 0 : index
    %0 = vector.load %arg1[%c0, %c0_0] : memref<2x128xf32, #tpu.memory_space<vmem>>, vector<2x128xf32>
    %c0_1 = arith.constant 0 : index
    %c0_2 = arith.constant 0 : index
    %1 = vector.load %arg2[%c0_1, %c0_2] : memref<128x2xf32, #tpu.memory_space<vmem>>, vector<128x2xf32>
    %c0_3 = arith.constant 0 : index
    %c0_4 = arith.constant 0 : index
    %2 = vector.load %arg3[%c0_3, %c0_4] : memref<128x1xf32, #tpu.memory_space<vmem>>, vector<128x1xf32>
    %3 = vector.extract_strided_slice %1 {offsets = [0, 0], sizes = [128, 1], strides = [1, 1]} : vector<128x2xf32> to vector<128x1xf32>
    %4 = vector.extract_strided_slice %0 {offsets = [0, 0], sizes = [1, 128], strides = [1, 1]} : vector<2x128xf32> to vector<1x128xf32>
    %5 = vector.broadcast %3 : vector<128x1xf32> to vector<128x128xf32>
    %6 = vector.broadcast %4 : vector<1x128xf32> to vector<128x128xf32>
    %7 = arith.mulf %5, %6 : vector<128x128xf32>
    %8 = vector.broadcast %2 : vector<128x1xf32> to vector<128x128xf32>
    %9 = arith.addf %8, %7 : vector<128x128xf32>
    %10 = vector.extract_strided_slice %1 {offsets = [0, 1], sizes = [128, 1], strides = [1, 1]} : vector<128x2xf32> to vector<128x1xf32>
    %11 = vector.extract_strided_slice %0 {offsets = [1, 0], sizes = [1, 128], strides = [1, 1]} : vector<2x128xf32> to vector<1x128xf32>
    %12 = vector.broadcast %10 : vector<128x1xf32> to vector<128x128xf32>
    %13 = vector.broadcast %11 : vector<1x128xf32> to vector<128x128xf32>
    %14 = arith.mulf %12, %13 : vector<128x128xf32>
    %15 = arith.addf %9, %14 : vector<128x128xf32>
    %16 = math.tanh %15 : vector<128x128xf32>
    %c0_5 = arith.constant 0 : index
    %c0_6 = arith.constant 0 : index
    %17 = vector.load %arg4[%c0_5, %c0_6] : memref<128x128xf32, #tpu.memory_space<vmem>>, vector<128x128xf32>
    %cst = arith.constant dense<0.000000e+00> : vector<128x128xf32>
    %18 = tpu.matmul %17, %16, %cst {dimension_numbers = #tpu.dot_dimension_numbers<[1], [0], [0], [1], [0, 0, 1, 1], [], []>} : vector<128x128xf32>, vector<128x128xf32>, vector<128x128xf32> -> vector<128x128xf32>
    %c0_7 = arith.constant 0 : index
    %c0_8 = arith.constant 0 : index
    %19 = vector.load %arg5[%c0_7, %c0_8] : memref<128x1xf32, #tpu.memory_space<vmem>>, vector<128x1xf32>
    %20 = vector.broadcast %19 : vector<128x1xf32> to vector<128x128xf32>
    %21 = arith.addf %18, %20 : vector<128x128xf32>
    %22 = math.tanh %21 : vector<128x128xf32>
    %c0_9 = arith.constant 0 : index
    %c0_10 = arith.constant 0 : index
    %23 = vector.load %arg6[%c0_9, %c0_10] : memref<1x128xf32, #tpu.memory_space<vmem>>, vector<1x128xf32>
    %cst_11 = arith.constant dense<0.000000e+00> : vector<1x128xf32>
    %24 = tpu.matmul %23, %22, %cst_11 {dimension_numbers = #tpu.dot_dimension_numbers<[1], [0], [0], [1], [0, 0, 1, 1], [], []>} : vector<1x128xf32>, vector<128x128xf32>, vector<1x128xf32> -> vector<1x128xf32>
    %c0_12 = arith.constant 0 : index
    %25 = memref.load %arg7[%c0_12] : memref<1xf32, #tpu.memory_space<smem>>
    %26 = vector.broadcast %25 : f32 to vector<1x128xf32>
    %27 = arith.addf %24, %26 : vector<1x128xf32>
    %c0_13 = arith.constant 0 : index
    %c0_14 = arith.constant 0 : index
    %28 = vector.load %arg8[%c0_13, %c0_14] : memref<1x128xf32, #tpu.memory_space<vmem>>, vector<1x128xf32>
    tpu.vector_store %arg8[%c0_13, %c0_14], %27 {strides = array<i32>} : memref<1x128xf32, #tpu.memory_space<vmem>>, vector<1x128xf32>,
    return
  }
  func.func @transform_0(%arg0: i32) -> (i32, i32) {
    %c0_i32 = arith.constant 0 : i32
    %c0_i32_0 = arith.constant 0 : i32
    return %c0_i32, %arg0 : i32, i32
  }
  func.func @transform_1(%arg0: i32) -> (i32, i32) {
    %c0_i32 = arith.constant 0 : i32
    %c0_i32_0 = arith.constant 0 : i32
    %c0_i32_1 = arith.constant 0 : i32
    return %c0_i32, %c0_i32_0 : i32, i32
  }
  func.func @transform_2(%arg0: i32) -> (i32, i32) {
    %c0_i32 = arith.constant 0 : i32
    %c0_i32_0 = arith.constant 0 : i32
    %c0_i32_1 = arith.constant 0 : i32
    return %c0_i32, %c0_i32_0 : i32, i32
  }
  func.func @transform_3(%arg0: i32) -> (i32, i32) {
    %c0_i32 = arith.constant 0 : i32
    %c0_i32_0 = arith.constant 0 : i32
    %c0_i32_1 = arith.constant 0 : i32
    return %c0_i32, %c0_i32_0 : i32, i32
  }
  func.func @transform_4(%arg0: i32) -> (i32, i32) {
    %c0_i32 = arith.constant 0 : i32
    %c0_i32_0 = arith.constant 0 : i32
    %c0_i32_1 = arith.constant 0 : i32
    return %c0_i32, %c0_i32_0 : i32, i32
  }
  func.func @transform_5(%arg0: i32) -> (i32, i32) {
    %c0_i32 = arith.constant 0 : i32
    %c0_i32_0 = arith.constant 0 : i32
    %c0_i32_1 = arith.constant 0 : i32
    return %c0_i32, %c0_i32_0 : i32, i32
  }
  func.func @transform_6(%arg0: i32) -> i32 {
    %c0_i32 = arith.constant 0 : i32
    %c0_i32_0 = arith.constant 0 : i32
    return %c0_i32 : i32
  }
  func.func @transform_7(%arg0: i32) -> (i32, i32) {
    %c0_i32 = arith.constant 0 : i32
    %c0_i32_0 = arith.constant 0 : i32
    return %c0_i32, %arg0 : i32, i32
  }
}

</mosaic_0001>

<bundles_post_ra>
// kernel: _forward_impl.1
= control target key start
LH: loop header
LB: loop body
LE: loop exit
PB: predicated region body
PF: predicated region fallthrough
CT: control target
= control target key end

     0   :  { %v697_v0 = vmov 1   ;;  %v698_v1 = vmov 0   ;;  %s997_s2 = inlined_call_operand.vmem [shape: f32[128,1], index: 2, kind: input, shape index: {}]   ;;  %s998_s1 = inlined_call_operand.vmem [shape: f32[128,2], index: 1, kind: input, shape index: {}]   ;;  %s999_s0 = inlined_call_operand.vmem [shape: f32[2,128], index: 0, kind: input, shape index: {}]   ;;  %s1000_s4 = inlined_call_operand.vmem [shape: f32[128,1], index: 4, kind: input, shape index: {}]   ;;  %s1001_s3 = inlined_call_operand.vmem [shape: f32[128,128], index: 3, kind: input, shape index: {}]   ;;  %s1002_s5 = inlined_call_operand.vmem [shape: f32[1,128], index: 5, kind: input, shape index: {}]   ;;  %s1003_s6 = inlined_call_operand.<no memory space> [shape: f32[1], index: 6, kind: input, shape index: {}]   ;;  %s1004_s7 = inlined_call_operand.vmem [shape: f32[1,128], index: 7, kind: output, shape index: {}]  }
   0x1   :  { %624 = vset.pattern.permute.xlu0 %v697_v0  ;;  %623 = vset.pattern.permute.xlu2 %v698_v1  ;;  %v59_v2 = vld [vmem:[%s997_s2 + $0x78] sm:$0xff]  ;;  %v42_v3 = vld [vmem:[%s998_s1 + $0x70] sm:$0xff]  ;;  %v41_v4 = vld [vmem:[%s998_s1 + $0x68] sm:$0xff] }
   0x2   :  { %621 = vset.pattern.permute.xlu1 %v698_v1  ;;  %310 = vperm.xlu0 %624, %v42_v3   ;;  %v58_v5 = vld [vmem:[%s997_s2 + $0x70] sm:$0xff]  ;;  %v43_v6 = vld [vmem:[%s998_s1 + $0x78] sm:$0xff]  ;;  %v57_v7 = vld [vmem:[%s997_s2 + $0x68] sm:$0xff] }
   0x3   :  { %234 = vperm.xlu1 %621, %v59_v2   ;;  %127 = vperm.xlu2 %623, %v41_v4   ;;  %v40_v8 = vld [vmem:[%s998_s1 + $0x60] sm:$0xff]  ;;  %v39_v9 = vld [vmem:[%s998_s1 + $0x58] sm:$0xff]  ;;  %v38_v11 = vld [vmem:[%s998_s1 + $0x50] sm:$0xff] }
   0x4   :  { %v56_v10 = vld [vmem:[%s997_s2 + $0x60] sm:$0xff]  ;;  %v37_v12 = vld [vmem:[%s998_s1 + $0x48] sm:$0xff]  ;;  %v55_v14 = vld [vmem:[%s997_s2 + $0x58] sm:$0xff] }
   0x5   :  { %v36_v13 = vld [vmem:[%s998_s1 + $0x40] sm:$0xff]  ;;  %v35_v15 = vld [vmem:[%s998_s1 + $0x38] sm:$0xff]  ;;  %v54_v16 = vld [vmem:[%s997_s2 + $0x50] sm:$0xff] }
   0x6   :  { %v34_v17 = vld [vmem:[%s998_s1 + $0x30] sm:$0xff]  ;;  %v53_v18 = vld [vmem:[%s997_s2 + $0x48] sm:$0xff]  ;;  %v52_v20 = vld [vmem:[%s997_s2 + $0x40] sm:$0xff] }
   0x7   :  { %v33_v19 = vld [vmem:[%s998_s1 + $0x28] sm:$0xff]  ;;  %v32_v21 = vld [vmem:[%s998_s1 + $0x20] sm:$0xff]  ;;  %v51_v22 = vld [vmem:[%s997_s2 + $0x38] sm:$0xff] }
   0x8   :  { %v31_v23 = vld [vmem:[%s998_s1 + $0x18] sm:$0xff]  ;;  %v50_v24 = vld [vmem:[%s997_s2 + $0x30] sm:$0xff]  ;;  %v49_v26 = vld [vmem:[%s997_s2 + $0x28] sm:$0xff] }
   0x9   :  { %v30_v25 = vld [vmem:[%s998_s1 + $0x10] sm:$0xff]  ;;  %v29_v28 = vld [vmem:[%s998_s1 + $0x8] sm:$0xff]  ;;  %v48_v29 = vld [vmem:[%s997_s2 + $0x20] sm:$0xff] }
   0xa   :  { %625 = vset.pattern.permute.xlu0 %v698_v1  ;;  %v28_v31 = vld [vmem:[%s998_s1] sm:$0xff]  ;;  %v47_v32 = vld [vmem:[%s997_s2 + $0x18] sm:$0xff]  ;;  %v46_v36 = vld [vmem:[%s997_s2 + $0x10] sm:$0xff] }
   0xb   :  { %622 = vset.pattern.permute.xlu1 %v697_v0  ;;  %229 = vperm.xlu2 %623, %v58_v5   ;;  %v44_v34 = vld [vmem:[%s997_s2] sm:$0xff]  ;;  %v396_v40 = vld [vmem:[%s1000_s4 + $0x70] sm:$0xff]  ;;  %v45_v42 = vld [vmem:[%s997_s2 + $0x8] sm:$0xff] }
   0xc   :  { %314 = vperm.xlu1 %622, %v43_v6   ;;  %137 = vperm.xlu0 %625, %v43_v6   ;;  %v27_v39 = vld [vmem:[%s999_s0] sm:$0x3]  ;;  %v393_v50 = vld [vmem:[%s1000_s4 + $0x58] sm:$0xff] }
   0xd   :  { %v849_v41 = vperm.slane %v27_v39, 0  ;;  %v854_v43 = vperm.slane %v27_v39, 1  ;;  %v390_v57 = vld [vmem:[%s1000_s4 + $0x40] sm:$0xff] }
  0x13   :  { %224 = vperm.xlu2 %623, %v57_v7  }
  0x14   :  { %626 = vset.pattern.permute.xlu1 %v698_v1  ;;  %132 = vperm.xlu0 %625, %v42_v3   ;;  %v387_v3 = vld [vmem:[%s1000_s4 + $0x28] sm:$0xff] }
  0x15   :  { %122 = vperm.xlu1 %626, %v40_v8  }
  0x1b   :  { %117 = vperm.xlu2 %623, %v39_v9  }
  0x1c   :  { %219 = vperm.xlu0 %625, %v56_v10  }
  0x1d   :  { %627 = vset.pattern.permute.xlu1 %v697_v0 }
  0x1e   :  { %306 = vperm.xlu1 %627, %v41_v4  }
  0x23   :  { %112 = vperm.xlu2 %623, %v38_v11  }
  0x24   :  { %107 = vperm.xlu0 %625, %v37_v12  }
  0x26   :  { %302 = vperm.xlu1 %627, %v40_v8  }
  0x2b   :  { %629 = vset.pattern.permute.xlu2 %v697_v0 }
  0x2c   :  { %298 = vperm.xlu2 %629, %v39_v9   ;;  %102 = vperm.xlu0 %625, %v36_v13  }
  0x2e   :  { %628 = vset.pattern.permute.xlu1 %v698_v1 }
  0x2f   :  { %214 = vperm.xlu1 %628, %v55_v14  }
  0x34   :  { %294 = vperm.xlu2 %629, %v38_v11   ;;  %97 = vperm.xlu0 %625, %v35_v15   ;;  %v384_v11 = vld [vmem:[%s1000_s4 + $0x10] sm:$0xff] }
  0x37   :  { %209 = vperm.xlu1 %628, %v54_v16  }
  0x3c   :  { %290 = vperm.xlu2 %629, %v37_v12   ;;  %92 = vperm.xlu0 %625, %v34_v17  }
  0x3f   :  { %204 = vperm.xlu1 %628, %v53_v18  }
  0x44   :  { %286 = vperm.xlu2 %629, %v36_v13   ;;  %87 = vperm.xlu0 %625, %v33_v19  }
  0x47   :  { %199 = vperm.xlu1 %628, %v52_v20  }
  0x4c   :  { %282 = vperm.xlu2 %629, %v35_v15   ;;  %82 = vperm.xlu0 %625, %v32_v21  }
  0x4f   :  { %194 = vperm.xlu1 %628, %v51_v22  }
  0x54   :  { %278 = vperm.xlu2 %629, %v34_v17   ;;  %77 = vperm.xlu0 %625, %v31_v23  }
  0x57   :  { %189 = vperm.xlu1 %628, %v50_v24  }
  0x5c   :  { %274 = vperm.xlu2 %629, %v33_v19   ;;  %72 = vperm.xlu0 %625, %v30_v25  }
  0x5d   :  { %v128_v27 = vpop.permute.xlu2 %127 }
  0x5e   :  { %v154_v61 = vmul.f32 %v849_v41, %v128_v27 }
  0x5f   :  { %184 = vperm.xlu1 %628, %v49_v26  }
  0x64   :  { %270 = vperm.xlu2 %629, %v32_v21   ;;  %67 = vperm.xlu0 %625, %v29_v28  }
  0x65   :  { %v230_v30 = vpop.permute.xlu2 %229 }
  0x67   :  { %179 = vperm.xlu1 %628, %v48_v29  }
  0x6c   :  { %266 = vperm.xlu2 %629, %v31_v23   ;;  %62 = vperm.xlu0 %625, %v28_v31  }
  0x6d   :  { %v225_v33 = vpop.permute.xlu2 %224 }
  0x6f   :  { %174 = vperm.xlu1 %628, %v47_v32  }
  0x74   :  { %262 = vperm.xlu2 %629, %v30_v25   ;;  %159 = vperm.xlu0 %625, %v44_v34   ;;  %v311_v35 = vpop.permute.xlu0 %310 }
  0x75   :  { %v235_v37 = vpop.permute.xlu1 %234  ;;  %v841_v38 = vpop.permute.xlu2 %117  ;;  %v332_v53 = vmul.f32 %v854_v43, %v311_v35 }
  0x76   :  { %v152_v16 = vmul.f32 %v849_v41, %v841_v38 }
  0x77   :  { %169 = vperm.xlu1 %628, %v46_v36  }
  0x7c   :  { %258 = vperm.xlu2 %629, %v29_v28   ;;  %470 = vperm.xlu0 %625, %v396_v40  }
  0x7d   :  { %v113_v49 = vpop.permute.xlu2 %112 }
  0x7e   :  { %v315_v44 = vpop.permute.xlu1 %314  ;;  %v138_v45 = vpop.permute.xlu0 %137  ;;  %v151_v22 = vmul.f32 %v849_v41, %v113_v49 }
  0x7f   :  { %v156_v46 = vmul.f32 %v849_v41, %v138_v45  ;;  %164 = vperm.xlu1 %628, %v45_v42   ;;  %v333_v47 = vmul.f32 %v854_v43, %v315_v44 }
  0x81   :  { %v252_v48 = vadd.f32 %v235_v37, %v156_v46 }
  0x83   :  { %v349_v51 = vadd.f32 %v333_v47, %v252_v48 }
  0x84   :  { %455 = vperm.xlu0 %625, %v393_v50   ;;  %631 = vset.pattern.permute.xlu2 %v698_v1 }
  0x85   :  { %633 = vtanh.f32 %v349_v51 }
  0x86   :  { %v133_v52 = vpop.permute.xlu0 %132  ;;  %v299_v60 = vpop.permute.xlu2 %298 }
  0x87   :  { %v155_v54 = vmul.f32 %v849_v41, %v133_v52  ;;  %630 = vset.pattern.permute.xlu1 %v697_v0  ;;  %v123_v55 = vpop.permute.xlu1 %122  ;;  %v250_v0 = vadd.f32 %v225_v33, %v154_v61  ;;  %v329_v17 = vmul.f32 %v854_v43, %v299_v60 }
  0x88   :  { %254 = vperm.xlu1 %630, %v28_v31   ;;  %v153_v8 = vmul.f32 %v849_v41, %v123_v55 }
  0x89   :  { %v251_v56 = vadd.f32 %v230_v30, %v155_v54 }
  0x8b   :  { %v634_v58 = vpop.eup %633  ;;  %v348_v59 = vadd.f32 %v332_v53, %v251_v56 }
  0x8c   :  { %440 = vperm.xlu0 %625, %v390_v57   ;;  %478 = vmatpush.msra.mxu0 %v634_v58 }
  0x8d   :  { %635 = vtanh.f32 %v348_v59  ;;  %587 = vmatpush.msra.mxu2 %v634_v58  ;;  %588 = vmatpush.msra.mxu3 %v634_v58 }
  0x8e   :  { %v220_v62 = vpop.permute.xlu0 %219  ;;  %v295_v6 = vpop.permute.xlu2 %294 }
  0x8f   :  { %v328_v23 = vmul.f32 %v854_v43, %v295_v6 }
  0x90   :  { %v307_v63 = vpop.permute.xlu1 %306  ;;  %632 = vset.pattern.permute.xlu1 %v698_v1  ;;  %v249_v1 = vadd.f32 %v220_v62, %v153_v8 }
  0x91   :  { %v331_v2 = vmul.f32 %v854_v43, %v307_v63 }
  0x93   :  { %v636_v4 = vpop.eup %635  ;;  %v347_v5 = vadd.f32 %v331_v2, %v250_v0 }
  0x94   :  { %425 = vperm.xlu0 %625, %v387_v3   ;;  %479 = vmatpush.msra.mxu0 %v636_v4 }
  0x95   :  { %637 = vtanh.f32 %v347_v5  ;;  %589 = vmatpush.msra.mxu2 %v636_v4  ;;  %590 = vmatpush.msra.mxu3 %v636_v4 }
  0x96   :  { %v108_v7 = vpop.permute.xlu0 %107  ;;  %v291_v15 = vpop.permute.xlu2 %290 }
  0x97   :  { %v150_v30 = vmul.f32 %v849_v41, %v108_v7  ;;  %v327_v32 = vmul.f32 %v854_v43, %v291_v15 }
  0x98   :  { %v303_v9 = vpop.permute.xlu1 %302 }
  0x99   :  { %v330_v10 = vmul.f32 %v854_v43, %v303_v9 }
  0x9b   :  { %v638_v12 = vpop.eup %637  ;;  %v346_v13 = vadd.f32 %v330_v10, %v249_v1 }
  0x9c   :  { %410 = vperm.xlu0 %625, %v384_v11   ;;  %480 = vmatpush.msra.mxu0 %v638_v12 }
  0x9d   :  { %639 = vtanh.f32 %v346_v13  ;;  %591 = vmatpush.msra.mxu2 %v638_v12  ;;  %592 = vmatpush.msra.mxu3 %v638_v12 }
  0x9e   :  { %v103_v14 = vpop.permute.xlu0 %102  ;;  %v287_v25 = vpop.permute.xlu2 %286 }
  0x9f   :  { %v149_v38 = vmul.f32 %v849_v41, %v103_v14  ;;  %v326_v40 = vmul.f32 %v854_v43, %v287_v25 }
  0xa1   :  { %v215_v18 = vpop.permute.xlu1 %214 }
  0xa2   :  { %v248_v19 = vadd.f32 %v215_v18, %v152_v16 }
  0xa3   :  { %v640_v20 = vpop.eup %639 }
  0xa4   :  { %v345_v21 = vadd.f32 %v329_v17, %v248_v19  ;;  %481 = vmatpush.msra.mxu0 %v640_v20  ;;  %593 = vmatpush.msra.mxu2 %v640_v20 }
  0xa5   :  { %594 = vmatpush.msra.mxu3 %v640_v20 }
  0xa6   :  { %641 = vtanh.f32 %v345_v21  ;;  %v98_v24 = vpop.permute.xlu0 %97  ;;  %v283_v35 = vpop.permute.xlu2 %282 }
  0xa7   :  { %v148_v48 = vmul.f32 %v849_v41, %v98_v24  ;;  %v325_v50 = vmul.f32 %v854_v43, %v283_v35 }
  0xa9   :  { %v210_v26 = vpop.permute.xlu1 %209 }
  0xaa   :  { %v247_v27 = vadd.f32 %v210_v26, %v151_v22 }
  0xac   :  { %v642_v28 = vpop.eup %641  ;;  %v344_v29 = vadd.f32 %v328_v23, %v247_v27 }
  0xad   :  { %482 = vmatpush.msra.mxu0 %v642_v28  ;;  %595 = vmatpush.msra.mxu2 %v642_v28 }
  0xae   :  { %643 = vtanh.f32 %v344_v29  ;;  %596 = vmatpush.msra.mxu3 %v642_v28  ;;  %v93_v33 = vpop.permute.xlu0 %92  ;;  %v279_v47 = vpop.permute.xlu2 %278 }
  0xaf   :  { %v147_v56 = vmul.f32 %v849_v41, %v93_v33  ;;  %v324_v58 = vmul.f32 %v854_v43, %v279_v47  ;;  %v392_v47 = vld [vmem:[%s1000_s4 + $0x50] sm:$0xff] }
  0xb1   :  { %v205_v31 = vpop.permute.xlu1 %204 }
  0xb2   :  { %v246_v34 = vadd.f32 %v205_v31, %v150_v30 }
  0xb4   :  { %v644_v36 = vpop.eup %643  ;;  %v343_v37 = vadd.f32 %v327_v32, %v246_v34 }
  0xb5   :  { %483 = vmatpush.msra.mxu0 %v644_v36  ;;  %597 = vmatpush.msra.mxu2 %v644_v36 }
  0xb6   :  { %645 = vtanh.f32 %v343_v37  ;;  %598 = vmatpush.msra.mxu3 %v644_v36  ;;  %v88_v45 = vpop.permute.xlu0 %87  ;;  %v275_v55 = vpop.permute.xlu2 %274  ;;  %v395_v37 = vld [vmem:[%s1000_s4 + $0x68] sm:$0xff] }
  0xb7   :  { %v146_v62 = vmul.f32 %v849_v41, %v88_v45  ;;  %v323_v3 = vmul.f32 %v854_v43, %v275_v55  ;;  %465 = vperm.xlu1 %632, %v395_v37   ;;  %v391_v55 = vld [vmem:[%s1000_s4 + $0x48] sm:$0xff] }
  0xb9   :  { %v200_v39 = vpop.permute.xlu1 %199 }
  0xba   :  { %v245_v42 = vadd.f32 %v200_v39, %v149_v38 }
  0xbc   :  { %v646_v44 = vpop.eup %645  ;;  %v342_v46 = vadd.f32 %v326_v40, %v245_v42 }
  0xbd   :  { %484 = vmatpush.msra.mxu0 %v646_v44  ;;  %599 = vmatpush.msra.mxu2 %v646_v44 }
  0xbe   :  { %647 = vtanh.f32 %v342_v46  ;;  %600 = vmatpush.msra.mxu3 %v646_v44  ;;  %v83_v54 = vpop.permute.xlu0 %82  ;;  %v271_v0 = vpop.permute.xlu2 %270  ;;  %v397_v46 = vld [vmem:[%s1000_s4 + $0x78] sm:$0xff] }
  0xbf   :  { %v145_v7 = vmul.f32 %v849_v41, %v83_v54  ;;  %v322_v9 = vmul.f32 %v854_v43, %v271_v0  ;;  %475 = vperm.xlu2 %631, %v397_v46   ;;  %450 = vperm.xlu1 %632, %v392_v47   ;;  %v376_v54 = vld [vmem:[%s1001_s3 + $0x50] sm:$0xff]  ;;  %v378_v0 = vld [vmem:[%s1001_s3 + $0x60] sm:$0xff] }
  0xc1   :  { %v195_v49 = vpop.permute.xlu1 %194 }
  0xc2   :  { %v244_v51 = vadd.f32 %v195_v49, %v148_v48  ;;  %v370_v48 = vld [vmem:[%s1001_s3 + $0x20] sm:$0xff]  ;;  %v375_v49 = vld [vmem:[%s1001_s3 + $0x48] sm:$0xff] }
  0xc4   :  { %v648_v52 = vpop.eup %647  ;;  %v341_v53 = vadd.f32 %v325_v50, %v244_v51  ;;  %v394_v50 = vld [vmem:[%s1000_s4 + $0x60] sm:$0xff]  ;;  %v389_v51 = vld [vmem:[%s1000_s4 + $0x38] sm:$0xff] }
  0xc5   :  { %485 = vmatpush.msra.mxu0 %v648_v52  ;;  %601 = vmatpush.msra.mxu2 %v648_v52 }
  0xc6   :  { %649 = vtanh.f32 %v341_v53  ;;  %602 = vmatpush.msra.mxu3 %v648_v52  ;;  %v78_v63 = vpop.permute.xlu0 %77  ;;  %v267_v11 = vpop.permute.xlu2 %266  ;;  %v367_v52 = vld [vmem:[%s1001_s3 + $0x8] sm:$0xff] }
  0xc7   :  { %v144_v14 = vmul.f32 %v849_v41, %v78_v63  ;;  %v321_v16 = vmul.f32 %v854_v43, %v267_v11  ;;  %460 = vperm.xlu2 %631, %v394_v50   ;;  %435 = vperm.xlu1 %632, %v389_v51   ;;  %v371_v53 = vld [vmem:[%s1001_s3 + $0x28] sm:$0xff]  ;;  %v373_v63 = vld [vmem:[%s1001_s3 + $0x38] sm:$0xff] }
  0xc9   :  { %v190_v57 = vpop.permute.xlu1 %189 }
  0xca   :  { %v243_v59 = vadd.f32 %v190_v57, %v147_v56  ;;  %v386_v56 = vld [vmem:[%s1000_s4 + $0x20] sm:$0xff]  ;;  %v368_v57 = vld [vmem:[%s1001_s3 + $0x10] sm:$0xff] }
  0xcc   :  { %v650_v60 = vpop.eup %649  ;;  %v340_v61 = vadd.f32 %v324_v58, %v243_v59  ;;  %v372_v58 = vld [vmem:[%s1001_s3 + $0x30] sm:$0xff]  ;;  %v377_v59 = vld [vmem:[%s1001_s3 + $0x58] sm:$0xff] }
  0xcd   :  { %486 = vmatpush.msra.mxu0 %v650_v60  ;;  %603 = vmatpush.msra.mxu2 %v650_v60 }
  0xce   :  { %651 = vtanh.f32 %v340_v61  ;;  %604 = vmatpush.msra.mxu3 %v650_v60  ;;  %v73_v1 = vpop.permute.xlu0 %72  ;;  %v263_v21 = vpop.permute.xlu2 %262  ;;  %v383_v60 = vld [vmem:[%s1000_s4 + $0x8] sm:$0xff]  ;;  %v388_v61 = vld [vmem:[%s1000_s4 + $0x30] sm:$0xff] }
  0xcf   :  { %v143_v22 = vmul.f32 %v849_v41, %v73_v1  ;;  %v320_v24 = vmul.f32 %v854_v43, %v263_v21  ;;  %445 = vperm.xlu2 %631, %v391_v55   ;;  %420 = vperm.xlu1 %632, %v386_v56  }
  0xd1   :  { %v185_v2 = vpop.permute.xlu1 %184 }
  0xd2   :  { %v242_v4 = vadd.f32 %v185_v2, %v146_v62  ;;  %v369_v62 = vld [vmem:[%s1001_s3 + $0x18] sm:$0xff] }
  0xd3   :  { %v385_v2 = vld [vmem:[%s1000_s4 + $0x18] sm:$0xff] }
  0xd4   :  { %v652_v5 = vpop.eup %651  ;;  %v339_v6 = vadd.f32 %v323_v3, %v242_v4  ;;  %v374_v3 = vld [vmem:[%s1001_s3 + $0x40] sm:$0xff]  ;;  %v379_v4 = vld [vmem:[%s1001_s3 + $0x68] sm:$0xff] }
  0xd5   :  { %487 = vmatpush.msra.mxu0 %v652_v5  ;;  %605 = vmatpush.msra.mxu2 %v652_v5 }
  0xd6   :  { %653 = vtanh.f32 %v339_v6  ;;  %606 = vmatpush.msra.mxu3 %v652_v5  ;;  %v68_v19 = vpop.permute.xlu0 %67  ;;  %v259_v29 = vpop.permute.xlu2 %258  ;;  %v382_v5 = vld [vmem:[%s1000_s4] sm:$0xff]  ;;  %v380_v6 = vld [vmem:[%s1001_s3 + $0x70] sm:$0xff] }
  0xd7   :  { %v142_v30 = vmul.f32 %v849_v41, %v68_v19  ;;  %v319_v32 = vmul.f32 %v854_v43, %v259_v29  ;;  %405 = vperm.xlu1 %632, %v383_v60   ;;  %430 = vperm.xlu2 %631, %v388_v61  }
  0xd9   :  { %v180_v8 = vpop.permute.xlu1 %179 }
  0xda   :  { %v241_v10 = vadd.f32 %v180_v8, %v145_v7  ;;  %v381_v7 = vld [vmem:[%s1001_s3 + $0x78] sm:$0xff] }
  0xdc   :  { %v654_v12 = vpop.eup %653  ;;  %v338_v13 = vadd.f32 %v322_v9, %v241_v10 }
  0xdd   :  { %488 = vmatpush.msra.mxu0 %v654_v12  ;;  %607 = vmatpush.msra.mxu2 %v654_v12 }
  0xde   :  { %655 = vtanh.f32 %v338_v13  ;;  %608 = vmatpush.msra.mxu3 %v654_v12  ;;  %v63_v28 = vpop.permute.xlu0 %62 }
  0xdf   :  { %v141_v38 = vmul.f32 %v849_v41, %v63_v28  ;;  %v366_v41 = vld [vmem:[%s1001_s3] sm:$0xff]  ;;  %415 = vperm.xlu2 %631, %v385_v2  }
  0xe1   :  { %v175_v15 = vpop.permute.xlu1 %174 }
  0xe2   :  { %v240_v17 = vadd.f32 %v175_v15, %v144_v14 }
  0xe4   :  { %v656_v18 = vpop.eup %655  ;;  %v337_v20 = vadd.f32 %v321_v16, %v240_v17 }
  0xe5   :  { %489 = vmatpush.msra.mxu0 %v656_v18  ;;  %609 = vmatpush.msra.mxu2 %v656_v18 }
  0xe6   :  { %657 = vtanh.f32 %v337_v20  ;;  %610 = vmatpush.msra.mxu3 %v656_v18  ;;  %v160_v36 = vpop.permute.xlu0 %159 }
  0xe7   :  { %v237_v40 = vadd.f32 %v160_v36, %v141_v38  ;;  %400 = vperm.xlu2 %631, %v382_v5  }
  0xe9   :  { %v170_v23 = vpop.permute.xlu1 %169 }
  0xea   :  { %v239_v25 = vadd.f32 %v170_v23, %v143_v22 }
  0xec   :  { %v658_v26 = vpop.eup %657  ;;  %v336_v27 = vadd.f32 %v320_v24, %v239_v25 }
  0xed   :  { %490 = vmatpush.msra.mxu0 %v658_v26  ;;  %611 = vmatpush.msra.mxu2 %v658_v26 }
  0xee   :  { %659 = vtanh.f32 %v336_v27  ;;  %612 = vmatpush.msra.mxu3 %v658_v26  ;;  %v471_v14 = vpop.permute.xlu0 %470 }
  0xf1   :  { %v165_v31 = vpop.permute.xlu1 %164 }
  0xf2   :  { %v238_v33 = vadd.f32 %v165_v31, %v142_v30 }
  0xf4   :  { %v660_v34 = vpop.eup %659  ;;  %v335_v35 = vadd.f32 %v319_v32, %v238_v33 }
  0xf5   :  { %491 = vmatpush.msra.mxu0 %v660_v34  ;;  %613 = vmatpush.msra.mxu2 %v660_v34 }
  0xf6   :  { %661 = vtanh.f32 %v335_v35  ;;  %614 = vmatpush.msra.mxu3 %v660_v34  ;;  %v456_v21 = vpop.permute.xlu0 %455 }
  0xfa   :  { %v255_v39 = vpop.permute.xlu1 %254 }
  0xfb   :  { %v318_v42 = vmul.f32 %v854_v43, %v255_v39 }
  0xfc   :  { %v662_v44 = vpop.eup %661 }
  0xfd   :  { %v334_v45 = vadd.f32 %v318_v42, %v237_v40  ;;  %492 = vmatpush.msra.mxu0 %v662_v44  ;;  %615 = vmatpush.msra.mxu2 %v662_v44 }
  0xfe   :  { %616 = vmatpush.msra.mxu3 %v662_v44  ;;  %v441_v30 = vpop.permute.xlu0 %440 }
  0xff   :  { %663 = vtanh.f32 %v334_v45 }
 0x105   :  { %v664_v43 = vpop.eup %663 }
 0x106   :  { %493 = vmatpush.msra.mxu0 %v664_v43  ;;  %617 = vmatpush.msra.mxu2 %v664_v43  ;;  %v426_v45 = vpop.permute.xlu0 %425 }
 0x107   :  { %618 = vmatpush.msra.mxu3 %v664_v43  ;;  %494 = vmatmul.f32.vlgmr.msra.gmra.mxu0 %v366_v41 }
 0x108   :  { %506 = vmatmul.f32.vlgmr.msra.gmra.mxu2 %v370_v48  ;;  %521 = vmatmul.f32.vlgmr.msra.gmra.mxu3 %v375_v49 }
 0x10f   :  { %497 = vmatmul.f32.gmra.mxu0 %v367_v52 }
 0x110   :  { %509 = vmatmul.f32.gmra.mxu2 %v371_v53  ;;  %524 = vmatmul.f32.gmra.mxu3 %v376_v54 }
 0x117   :  { %500 = vmatmul.f32.gmra.mxu0 %v368_v57  ;;  %v411_v57 = vpop.permute.xlu0 %410 }
 0x118   :  { %512 = vmatmul.f32.gmra.mxu2 %v372_v58  ;;  %527 = vmatmul.f32.gmra.mxu3 %v377_v59 }
 0x119   :  { %v476_v12 = vpop.permute.xlu2 %475 }
 0x11f   :  { %503 = vmatmul.f32.gmra.mxu0 %v369_v62 }
 0x120   :  { %515 = vmatmul.f32.gmra.mxu2 %v373_v63  ;;  %530 = vmatmul.f32.gmra.mxu3 %v378_v0 }
 0x121   :  { %v461_v16 = vpop.permute.xlu2 %460 }
 0x128   :  { %518 = vmatmul.f32.gmra.mxu2 %v374_v3  ;;  %533 = vmatmul.f32.gmra.mxu3 %v379_v4 }
 0x129   :  { %v466_v17 = vpop.permute.xlu1 %465  ;;  %v446_v22 = vpop.permute.xlu2 %445 }
 0x130   :  { %536 = vmatmul.f32.gmra.mxu3 %v380_v6 }
 0x131   :  { %v451_v23 = vpop.permute.xlu1 %450  ;;  %v431_v32 = vpop.permute.xlu2 %430 }
 0x138   :  { %539 = vmatmul.f32.gmra.mxu3 %v381_v7  ;;  %v559_v7 = vld [vmem:[%s1002_s5] sm:$0x1] }
 0x139   :  { %v436_v33 = vpop.permute.xlu1 %435  ;;  %v416_v41 = vpop.permute.xlu2 %415 }
 0x141   :  { %v421_v43 = vpop.permute.xlu1 %420  ;;  %v401_v61 = vpop.permute.xlu2 %400 }
 0x149   :  { %v406_v58 = vpop.permute.xlu1 %405 }
 0x184   :  { %v985_v19 = vpop.f32.mrf.mxu0 }
 0x185   :  { %v496_v2 = vadd.f32 %v985_v19, %v401_v61 }
 0x18b   :  { %v522_v8 = vpop.f32.mrf.mxu3  ;;  %v507_v10 = vpop.f32.mrf.mxu2 }
 0x18c   :  { %v498_v28 = vpop.f32.mrf.mxu0  ;;  %v523_v39 = vadd.f32 %v522_v8, %v446_v22  ;;  %v508_v54 = vadd.f32 %v507_v10, %v421_v43 }
 0x18d   :  { %v499_v63 = vadd.f32 %v498_v28, %v406_v58 }
 0x193   :  { %v525_v9 = vpop.f32.mrf.mxu3  ;;  %v510_v13 = vpop.f32.mrf.mxu2 }
 0x194   :  { %v526_v36 = vadd.f32 %v525_v9, %v451_v23  ;;  %v501_v40 = vpop.f32.mrf.mxu0  ;;  %v511_v51 = vadd.f32 %v510_v13, %v426_v45  ;;  %v561_v9 = vstv %s1003_s6 }
 0x195   :  { %v502_v60 = vadd.f32 %v501_v40, %v411_v57 }
 0x19b   :  { %v528_v1 = vpop.f32.mrf.mxu3  ;;  %v513_v18 = vpop.f32.mrf.mxu2 }
 0x19c   :  { %v529_v34 = vadd.f32 %v528_v1, %v456_v21  ;;  %v514_v49 = vadd.f32 %v513_v18, %v431_v32  ;;  %v504_v52 = vpop.f32.mrf.mxu0 }
 0x19d   :  { %v505_v56 = vadd.f32 %v504_v52, %v416_v41 }
 0x1a3   :  { %v531_v11 = vpop.f32.mrf.mxu3  ;;  %v516_v24 = vpop.f32.mrf.mxu2 }
 0x1a4   :  { %v532_v31 = vadd.f32 %v531_v11, %v461_v16  ;;  %v517_v47 = vadd.f32 %v516_v24, %v436_v33 }
 0x1ab   :  { %v534_v15 = vpop.f32.mrf.mxu3  ;;  %v519_v37 = vpop.f32.mrf.mxu2 }
 0x1ac   :  { %v535_v29 = vadd.f32 %v534_v15, %v466_v17  ;;  %v520_v44 = vadd.f32 %v519_v37, %v441_v30 }
 0x1b3   :  { %v537_v20 = vpop.f32.mrf.mxu3 }
 0x1b4   :  { %v538_v26 = vadd.f32 %v537_v20, %v471_v14 }
 0x1bb   :  { %v540_v25 = vpop.f32.mrf.mxu3 }
 0x1bc   :  { %v541_v27 = vadd.f32 %v540_v25, %v476_v12 }
 0x1be   :  { %665 = vtanh.f32 %v541_v27 }
 0x1bf   :  { %667 = vtanh.f32 %v538_v26 }
 0x1c0   :  { %669 = vtanh.f32 %v535_v29 }
 0x1c1   :  { %671 = vtanh.f32 %v532_v31 }
 0x1c2   :  { %673 = vtanh.f32 %v529_v34 }
 0x1c3   :  { %675 = vtanh.f32 %v526_v36 }
 0x1c4   :  { %v666_v35 = vpop.eup %665  ;;  %677 = vtanh.f32 %v523_v39 }
 0x1c5   :  { %562 = vmatpush.msra.mxu1 %v666_v35  ;;  %v668_v38 = vpop.eup %667  ;;  %679 = vtanh.f32 %v520_v44 }
 0x1c6   :  { %v670_v42 = vpop.eup %669  ;;  %681 = vtanh.f32 %v517_v47 }
 0x1c7   :  { %563 = vmatpush.msra.mxu1 %v668_v38  ;;  %v672_v46 = vpop.eup %671  ;;  %683 = vtanh.f32 %v514_v49 }
 0x1c8   :  { %v674_v48 = vpop.eup %673  ;;  %685 = vtanh.f32 %v511_v51 }
 0x1c9   :  { %564 = vmatpush.msra.mxu1 %v670_v42  ;;  %v676_v50 = vpop.eup %675  ;;  %687 = vtanh.f32 %v508_v54 }
 0x1ca   :  { %v678_v53 = vpop.eup %677  ;;  %689 = vtanh.f32 %v505_v56 }
 0x1cb   :  { %565 = vmatpush.msra.mxu1 %v672_v46  ;;  %v680_v55 = vpop.eup %679  ;;  %691 = vtanh.f32 %v502_v60 }
 0x1cc   :  { %v682_v59 = vpop.eup %681  ;;  %693 = vtanh.f32 %v499_v63 }
 0x1cd   :  { %566 = vmatpush.msra.mxu1 %v674_v48  ;;  %v684_v62 = vpop.eup %683  ;;  %695 = vtanh.f32 %v496_v2 }
 0x1ce   :  { %v686_v0 = vpop.eup %685 }
 0x1cf   :  { %567 = vmatpush.msra.mxu1 %v676_v50  ;;  %v688_v3 = vpop.eup %687 }
 0x1d0   :  { %v690_v4 = vpop.eup %689 }
 0x1d1   :  { %568 = vmatpush.msra.mxu1 %v678_v53  ;;  %v692_v5 = vpop.eup %691 }
 0x1d2   :  { %v694_v6 = vpop.eup %693 }
 0x1d3   :  { %569 = vmatpush.msra.mxu1 %v680_v55  ;;  %v696_v8 = vpop.eup %695 }
 0x1d5   :  { %570 = vmatpush.msra.mxu1 %v682_v59 }
 0x1d7   :  { %571 = vmatpush.msra.mxu1 %v684_v62 }
 0x1d9   :  { %572 = vmatpush.msra.mxu1 %v686_v0 }
 0x1db   :  { %573 = vmatpush.msra.mxu1 %v688_v3 }
 0x1dd   :  { %574 = vmatpush.msra.mxu1 %v690_v4 }
 0x1df   :  { %575 = vmatpush.msra.mxu1 %v692_v5 }
 0x1e1   :  { %576 = vmatpush.msra.mxu1 %v694_v6 }
 0x1e3   :  { %577 = vmatpush.msra.mxu1 %v696_v8 }
 0x1e4   :  { %578 = vmatmul.f32.vlgmr.msra.gmra.mxu1 %v559_v7 }
 0x261   :  { %v579_v1 = vpop.f32.mrf.mxu1 }
 0x262   :  { %v580_v10 = vadd.f32 %v579_v1, %v561_v9 }
 0x264   :  { %582 = vst [vmem:[%s1004_s7] sm:$0x1] %v580_v10 }

</bundles_post_ra>
